<compile_context>
chip_gen: v6e
topology: v6e:2x2x1
jax: 0.10.0
libtpu: 0.0.40
codegen_flags: <defaults>
</compile_context>

<pallas_src>
import jax
import jax.numpy as jnp
from jax.experimental import pallas as pl
from jax.experimental.pallas import tpu as pltpu


def _compute(x, th_ref, wy1_ref, wx_ref, bx_ref, wy2_ref, by_ref, o_ref):
    wdt = wy1_ref.dtype  # matmul operand dtype (bf16 by default); accumulation stays f32.

    # embedding_net_x with standardization folded into Wx'/bx': ReLU(theta @ Wx' + bx')
    th_emb = jnp.maximum(
        jnp.dot(th_ref[...].astype(wdt), wx_ref[...], preferred_element_type=jnp.float32)
        + bx_ref[...],
        0.0)

    # embedding_net_y on concat([x_std, theta_emb]) == x @ Wy1' + th_emb @ Wy2 + by'
    out = (jnp.dot(x.astype(wdt), wy1_ref[...], preferred_element_type=jnp.float32)
           + jnp.dot(th_emb.astype(wdt), wy2_ref[...], preferred_element_type=jnp.float32)
           + by_ref[...])
    o_ref[...] = out.astype(o_ref.dtype)


def _make_kernel(sigma, with_noise):
    # sigma is fixed at module-construction time (constructor arg of GaussianNoise), so baking
    # it into the kernel is fine; pass it as an SMEM scalar if it had to vary at runtime.
    if with_noise:
        def kernel(x_ref, noise_ref, th_ref, wy1_ref, wx_ref, bx_ref, wy2_ref, by_ref, o_ref):
            x = x_ref[...] + noise_ref[...] * sigma          # GaussianNoise (f32 elementwise)
            _compute(x, th_ref, wy1_ref, wx_ref, bx_ref, wy2_ref, by_ref, o_ref)
    else:
        def kernel(x_ref, th_ref, wy1_ref, wx_ref, bx_ref, wy2_ref, by_ref, o_ref):
            _compute(x_ref[...], th_ref, wy1_ref, wx_ref, bx_ref, wy2_ref, by_ref, o_ref)
    return kernel


def fold_params(params, lane_pad=128, weight_dtype=jnp.bfloat16):
    """Fold the two Standardize layers into the Linear weights/biases, zero-pad the hidden dim
    to a multiple of `lane_pad` (lane-dense unmasked output stores) and cast the matmul weights
    to `weight_dtype` (bf16 halves weight DMA/VMEM residency and gives ~3x MXU throughput on
    v6e/v7x; biases stay f32, accumulation is always f32).

    TODO(synk): for a scaled-up hidden dim on v6e/v7x use lane_pad=256 (256-wide MXU); keep 128
    for small H so the mem-bound output writeback is not inflated further.
    """
    mean_y, std_y = params["mean_y"], params["std_y"]   # (1, Dx)
    mean_x, std_x = params["mean_x"], params["std_x"]   # (1, Dt)
    Wx, bx = params["Wx"], params["bx"]                 # (Dt, H), (1, H)
    Wy1, Wy2, by = params["Wy1"], params["Wy2"], params["by"]

    Dx, H = Wy1.shape
    Dt = Wx.shape[0]
    inv_sy = 1.0 / std_y
    inv_sx = 1.0 / std_x

    Wy1f = Wy1 * inv_sy.reshape(Dx, 1)
    byf = by - (mean_y * inv_sy) @ Wy1
    Wxf = Wx * inv_sx.reshape(Dt, 1)
    bxf = bx - (mean_x * inv_sx) @ Wx

    Hp = ((H + lane_pad - 1) // lane_pad) * lane_pad
    pad_c = lambda a: jnp.pad(a, ((0, 0), (0, Hp - a.shape[1])))
    return {
        "Wy1f": pad_c(Wy1f).astype(weight_dtype),                               # (Dx, Hp)
        "Wxf": pad_c(Wxf).astype(weight_dtype),                                 # (Dt, Hp)
        "bxf": pad_c(bxf),                                                      # (1, Hp) f32
        "Wy2f": jnp.pad(Wy2, ((0, Hp - H), (0, Hp - H))).astype(weight_dtype),  # (Hp, Hp)
        "byf": pad_c(byf),                                                      # (1, Hp) f32
        "H": H,
    }


def _resident_spec(shape):
    """Constant-index_map (VMEM-resident) weight/bias block. Never re-fetched, so request
    single buffering (halves resident-weight VMEM; essential for scaled-up H on v7x's 64 MiB).
    Falls back to the default double-buffered spec if this JAX has no pipeline_mode/Buffered."""
    try:
        return pl.BlockSpec(shape, lambda i: (0, 0), pipeline_mode=pl.Buffered(1))
    except (TypeError, AttributeError):
        return pl.BlockSpec(shape, lambda i: (0, 0))


def standardize_inputs_forward(x, theta, folded, sigma, *, noise_key=None, add_noise=True,
                               block_b=1024, out_dtype=jnp.bfloat16, trim_output=False):
    """Fused forward. x:(B,Dx) f32, theta:(B,Dt) f32, folded: fold_params().
    Returns the padded (Bp, Hp) slab by default (logical data in out[:B, :H]); pass
    trim_output=True only if downstream cannot consume the padded layout (it costs an
    extra full pass over the output in HBM)."""
    B, Dx = x.shape
    Bt, Dt = theta.shape
    assert Bt == B
    Hp = folded["Wxf"].shape[1]
    H = folded["H"]
    apply_noise = add_noise and (sigma is not None)

    # Batch tile: large (amortizes the ~0.35us per-grid-step overhead), and at least 2 tiles
    # whenever B allows it so the "parallel" batch axis shards across both TCs on v7x.
    # Rounded to a multiple of 16 so bf16 output blocks are sublane-aligned.
    TB = min(block_b, max(B, 16))
    if B > 16:
        TB = min(TB, -(-B // 2))          # aim for >= 2 tiles
    TB = ((TB + 15) // 16) * 16
    Bp = ((B + TB - 1) // TB) * TB
    nb = Bp // TB

    if Bp != B:
        x = jnp.pad(x, ((0, Bp - B), (0, 0)))
        theta = jnp.pad(theta, ((0, Bp - B), (0, 0)))

    args = [x]
    in_specs = [pl.BlockSpec((TB, Dx), lambda i: (i, 0))]          # x tile (pipelined)
    if apply_noise:
        if noise_key is None:
            raise ValueError("noise_key is required when add_noise=True and sigma is set")
        # TODO(synk): replace with in-kernel pltpu.prng_seed+stateful_normal on real TPU to
        # drop this HBM stream; host-side jax.random is used because the hardware PRNG has
        # no interpret-mode lowering.
        noise = jax.random.normal(noise_key, (Bp, Dx), jnp.float32)
        args.append(noise)
        in_specs.append(pl.BlockSpec((TB, Dx), lambda i: (i, 0)))  # noise tile (pipelined)
    args.append(theta)
    in_specs.append(pl.BlockSpec((TB, Dt), lambda i: (i, 0)))      # theta tile (pipelined)

    in_specs += [_resident_spec((Dx, Hp)),   # Wy1'
                 _resident_spec((Dt, Hp)),   # Wx'
                 _resident_spec((1, Hp)),    # bx'
                 _resident_spec((Hp, Hp)),   # Wy2
                 _resident_spec((1, Hp))]    # by'
    args += [folded["Wy1f"], folded["Wxf"], folded["bxf"], folded["Wy2f"], folded["byf"]]

    out = pl.pallas_call(
        _make_kernel(sigma, apply_noise),
        out_shape=jax.ShapeDtypeStruct((Bp, Hp), out_dtype),       # bf16: halves the dominant
        grid=(nb,),                                                #       HBM writeback stream
        in_specs=in_specs,
        out_specs=pl.BlockSpec((TB, Hp), lambda i: (i, 0)),
        compiler_params=pltpu.CompilerParams(
            dimension_semantics=("parallel",),                     # v7x: tiles shared by 2 TCs
        ),
    )(*args)

    if trim_output:
        return out[:B, :H]
    return out


def _reference(x, theta, params):
    """Pure-JAX reference for the deterministic (add_noise=False) path."""
    xs = (x - params["mean_y"]) / params["std_y"]
    ts = (theta - params["mean_x"]) / params["std_x"]
    emb = jnp.maximum(ts @ params["Wx"] + params["bx"], 0.0)
    return xs @ params["Wy1"] + emb @ params["Wy2"] + params["by"]


if __name__ == "__main__":
    key = jax.random.PRNGKey(0)
    kx, kth, kbx, kby, kwx, kwy1, kwy2, kbn, knoise = jax.random.split(key, 9)

    B, Dx, Dt, H, N = 8, 16, 4, 32, 64
    sigma = 0.5

    x = jax.random.normal(kx, (B, Dx), jnp.float32)
    theta = jax.random.normal(kth, (B, Dt), jnp.float32)

    # "Training batches" used to build the standardizing nets (sbi: Standardize(mean, std)).
    batch_x = jax.random.normal(kbx, (N, Dt), jnp.float32) * 2.0 + 1.0
    batch_y = jax.random.normal(kby, (N, Dx), jnp.float32) * 0.5 - 0.3
    batch_y_noised = batch_y + jax.random.normal(kbn, (N, Dx), jnp.float32) * sigma

    # Clamp std at 1e-6 (not sbi's 1e-14) so folding 1/std into the weights cannot
    # overflow/denormalize f32 for degenerate features.
    min_std = 1e-6
    params = {
        "mean_x": jnp.mean(batch_x, axis=0, keepdims=True),
        "std_x": jnp.maximum(jnp.std(batch_x, axis=0, ddof=1, keepdims=True), min_std),
        "mean_y": jnp.mean(batch_y_noised, axis=0, keepdims=True),
        "std_y": jnp.maximum(jnp.std(batch_y_noised, axis=0, ddof=1, keepdims=True), min_std),
        # embedding_net_x: Linear(Dt -> H) + ReLU
        "Wx": jax.random.normal(kwx, (Dt, H), jnp.float32) * 0.1,
        "bx": jnp.zeros((1, H), jnp.float32),
        # embedding_net_y: Linear(Dx + H -> H) on concat([x, theta_emb]), split into two mats
        "Wy1": jax.random.normal(kwy1, (Dx, H), jnp.float32) * 0.1,
        "Wy2": jax.random.normal(kwy2, (H, H), jnp.float32) * 0.1,
        "by": jnp.zeros((1, H), jnp.float32),
    }

    folded = fold_params(params)   # bf16 matmul weights, f32 biases, Hp = 128

    # 1) Deterministic path (add_noise=False): check against the pure-JAX f32 reference
    #    (bf16 operands + bf16 output -> loose-ish tolerance).
    out_det = jax.block_until_ready(
        standardize_inputs_forward(x, theta, folded, sigma, add_noise=False))
    ref_det = _reference(x, theta, params)
    det_logical = out_det[:B, :H].astype(jnp.float32)
    assert det_logical.shape == (B, H)
    assert jnp.allclose(det_logical, ref_det, atol=5e-2, rtol=5e-2), "mismatch vs JAX reference"

    # 2) Noisy path (add_noise=True): noise is a jax.random draw fused into the kernel
    #    (not bit-identical to torch's .normal_()); check shape/finiteness and that the
    #    noise actually perturbed the output.
    out_noisy = jax.block_until_ready(
        standardize_inputs_forward(x, theta, folded, sigma, noise_key=knoise, add_noise=True))
    noisy_logical = out_noisy[:B, :H].astype(jnp.float32)
    assert noisy_logical.shape == (B, H)
    assert bool(jnp.all(jnp.isfinite(noisy_logical)))
    assert float(jnp.std(noisy_logical - det_logical)) > 0.0, "noise had no effect"

    print("KERNEL_OK")
</pallas_src>

<mosaic_0001>
module attributes {stable_mosaic.version = 11 : i64} {
  func.func @kernel(%arg0: i32, %arg1: memref<16x16xf32, #tpu.memory_space<vmem>>, %arg2: memref<16x4xf32, #tpu.memory_space<vmem>>, %arg3: memref<16x128xbf16, #tpu.memory_space<vmem>>, %arg4: memref<4x128xbf16, #tpu.memory_space<vmem>>, %arg5: memref<1x128xf32, #tpu.memory_space<vmem>>, %arg6: memref<128x128xbf16, #tpu.memory_space<vmem>>, %arg7: memref<1x128xf32, #tpu.memory_space<vmem>>, %arg8: memref<16x128xbf16, #tpu.memory_space<vmem>>) attributes {dimension_semantics = [#tpu.dimension_semantics<parallel>], iteration_bounds = array<i64: 1>, scalar_prefetch = 0 : i64, scratch_operands = 0 : i64, tpu.core_type = #tpu.core_type<tc>, window_params = [{transform_indices = @transform_0, window_bounds = array<i64: 16, 16>}, {transform_indices = @transform_1, window_bounds = array<i64: 16, 4>}, {pipeline_mode = #tpu.pipeline_mode<synchronous>, transform_indices = @transform_2, window_bounds = array<i64: 16, 128>}, {pipeline_mode = #tpu.pipeline_mode<synchronous>, transform_indices = @transform_3, window_bounds = array<i64: 4, 128>}, {pipeline_mode = #tpu.pipeline_mode<synchronous>, transform_indices = @transform_4, window_bounds = array<i64: 1, 128>}, {pipeline_mode = #tpu.pipeline_mode<synchronous>, transform_indices = @transform_5, window_bounds = array<i64: 128, 128>}, {pipeline_mode = #tpu.pipeline_mode<synchronous>, transform_indices = @transform_6, window_bounds = array<i64: 1, 128>}, {transform_indices = @transform_7, window_bounds = array<i64: 16, 128>}]} {
    %c0 = arith.constant 0 : index
    %c0_0 = arith.constant 0 : index
    %0 = vector.load %arg1[%c0, %c0_0] : memref<16x16xf32, #tpu.memory_space<vmem>>, vector<16x16xf32>
    %c0_1 = arith.constant 0 : index
    %c0_2 = arith.constant 0 : index
    %1 = vector.load %arg2[%c0_1, %c0_2] : memref<16x4xf32, #tpu.memory_space<vmem>>, vector<16x4xf32>
    %2 = arith.truncf %1 : vector<16x4xf32> to vector<16x4xbf16>
    %c0_3 = arith.constant 0 : index
    %c0_4 = arith.constant 0 : index
    %3 = vector.load %arg4[%c0_3, %c0_4] : memref<4x128xbf16, #tpu.memory_space<vmem>>, vector<4x128xbf16>
    %cst = arith.constant dense<0.000000e+00> : vector<16x128xf32>
    %4 = tpu.matmul %2, %3, %cst {dimension_numbers = #tpu.dot_dimension_numbers<[1], [0], [0], [1], [0, 0, 1, 1], [], []>} : vector<16x4xbf16>, vector<4x128xbf16>, vector<16x128xf32> -> vector<16x128xf32>
    %c0_5 = arith.constant 0 : index
    %c0_6 = arith.constant 0 : index
    %5 = vector.load %arg5[%c0_5, %c0_6] : memref<1x128xf32, #tpu.memory_space<vmem>>, vector<1x128xf32>
    %6 = vector.broadcast %5 : vector<1x128xf32> to vector<16x128xf32>
    %7 = arith.addf %4, %6 : vector<16x128xf32>
    %cst_7 = arith.constant 0.000000e+00 : f32
    %8 = vector.broadcast %cst_7 : f32 to vector<16x128xf32>
    %9 = arith.maximumf %7, %8 : vector<16x128xf32>
    %10 = arith.truncf %0 : vector<16x16xf32> to vector<16x16xbf16>
    %c0_8 = arith.constant 0 : index
    %c0_9 = arith.constant 0 : index
    %11 = vector.load %arg3[%c0_8, %c0_9] : memref<16x128xbf16, #tpu.memory_space<vmem>>, vector<16x128xbf16>
    %cst_10 = arith.constant dense<0.000000e+00> : vector<16x128xf32>
    %12 = tpu.matmul %10, %11, %cst_10 {dimension_numbers = #tpu.dot_dimension_numbers<[1], [0], [0], [1], [0, 0, 1, 1], [], []>} : vector<16x16xbf16>, vector<16x128xbf16>, vector<16x128xf32> -> vector<16x128xf32>
    %13 = arith.truncf %9 : vector<16x128xf32> to vector<16x128xbf16>
    %c0_11 = arith.constant 0 : index
    %c0_12 = arith.constant 0 : index
    %14 = vector.load %arg6[%c0_11, %c0_12] : memref<128x128xbf16, #tpu.memory_space<vmem>>, vector<128x128xbf16>
    %cst_13 = arith.constant dense<0.000000e+00> : vector<16x128xf32>
    %15 = tpu.matmul %13, %14, %cst_13 {dimension_numbers = #tpu.dot_dimension_numbers<[1], [0], [0], [1], [0, 0, 1, 1], [], []>} : vector<16x128xbf16>, vector<128x128xbf16>, vector<16x128xf32> -> vector<16x128xf32>
    %16 = arith.addf %12, %15 : vector<16x128xf32>
    %c0_14 = arith.constant 0 : index
    %c0_15 = arith.constant 0 : index
    %17 = vector.load %arg7[%c0_14, %c0_15] : memref<1x128xf32, #tpu.memory_space<vmem>>, vector<1x128xf32>
    %18 = vector.broadcast %17 : vector<1x128xf32> to vector<16x128xf32>
    %19 = arith.addf %16, %18 : vector<16x128xf32>
    %20 = arith.truncf %19 : vector<16x128xf32> to vector<16x128xbf16>
    %c0_16 = arith.constant 0 : index
    %c0_17 = arith.constant 0 : index
    %21 = vector.load %arg8[%c0_16, %c0_17] : memref<16x128xbf16, #tpu.memory_space<vmem>>, vector<16x128xbf16>
    tpu.vector_store %arg8[%c0_16, %c0_17], %20 {strides = array<i32>} : memref<16x128xbf16, #tpu.memory_space<vmem>>, vector<16x128xbf16>,
    return
  }
  func.func @transform_0(%arg0: i32) -> (i32, i32) {
    %c0_i32 = arith.constant 0 : i32
    %c0_i32_0 = arith.constant 0 : i32
    return %arg0, %c0_i32 : i32, i32
  }
  func.func @transform_1(%arg0: i32) -> (i32, i32) {
    %c0_i32 = arith.constant 0 : i32
    %c0_i32_0 = arith.constant 0 : i32
    return %arg0, %c0_i32 : i32, i32
  }
  func.func @transform_2(%arg0: i32) -> (i32, i32) {
    %c0_i32 = arith.constant 0 : i32
    %c0_i32_0 = arith.constant 0 : i32
    %c0_i32_1 = arith.constant 0 : i32
    return %c0_i32, %c0_i32_0 : i32, i32
  }
  func.func @transform_3(%arg0: i32) -> (i32, i32) {
    %c0_i32 = arith.constant 0 : i32
    %c0_i32_0 = arith.constant 0 : i32
    %c0_i32_1 = arith.constant 0 : i32
    return %c0_i32, %c0_i32_0 : i32, i32
  }
  func.func @transform_4(%arg0: i32) -> (i32, i32) {
    %c0_i32 = arith.constant 0 : i32
    %c0_i32_0 = arith.constant 0 : i32
    %c0_i32_1 = arith.constant 0 : i32
    return %c0_i32, %c0_i32_0 : i32, i32
  }
  func.func @transform_5(%arg0: i32) -> (i32, i32) {
    %c0_i32 = arith.constant 0 : i32
    %c0_i32_0 = arith.constant 0 : i32
    %c0_i32_1 = arith.constant 0 : i32
    return %c0_i32, %c0_i32_0 : i32, i32
  }
  func.func @transform_6(%arg0: i32) -> (i32, i32) {
    %c0_i32 = arith.constant 0 : i32
    %c0_i32_0 = arith.constant 0 : i32
    %c0_i32_1 = arith.constant 0 : i32
    return %c0_i32, %c0_i32_0 : i32, i32
  }
  func.func @transform_7(%arg0: i32) -> (i32, i32) {
    %c0_i32 = arith.constant 0 : i32
    %c0_i32_0 = arith.constant 0 : i32
    return %arg0, %c0_i32 : i32, i32
  }
}

</mosaic_0001>

<bundles_post_ra>
// kernel: tpu_custom_call.1
= control target key start
LH: loop header
LB: loop body
LE: loop exit
PB: predicated region body
PF: predicated region fallthrough
CT: control target
= control target key end

     0   :  { %12 = vsyncpa [#allocation3], 0  ;;  %s555_s0 = inlined_call_operand.vmem [shape: f32[16,16], index: 0, kind: input, shape index: {}]   ;;  %s556_s1 = inlined_call_operand.vmem [shape: f32[16,4], index: 1, kind: input, shape index: {}]   ;;  %s557_s2 = inlined_call_operand.hbm [shape: bf16[16,128], index: 2, kind: input, shape index: {}]   ;;  %s558_s3 = inlined_call_operand.vmem [shape: bf16[4,128], index: 3, kind: input, shape index: {}]   ;;  %s559_s4 = inlined_call_operand.vmem [shape: f32[1,128], index: 4, kind: input, shape index: {}]   ;;  %s560_s5 = inlined_call_operand.hbm [shape: bf16[128,128], index: 5, kind: input, shape index: {}]   ;;  %s561_s6 = inlined_call_operand.vmem [shape: f32[1,128], index: 6, kind: input, shape index: {}]   ;;  %s562_s7 = inlined_call_operand.hbm [shape: bf16[16,128], index: 7, kind: output, shape index: {}]  }
   0x1   :  { %13 = vsyncpa [#allocation6], 0 }
   0x2   :  { %14 = vsyncpa [#allocation4], 0  ;;  %s466_s24 = smov [#allocation2]  }
   0x3   :  { %s24_s25 = sshll.u32 %s466_s24, 4  ;;  %s25_s25 = int_to_ptr.vmem [resolvable:$true] %s24_s25 }
   0x4   :  { %s408_s26 = scalar_lea.vmem %s25_s25, 128  ;;  %p413_p1 = scmp.lt.s32.totalorder %s25_s25, %s25_s25 }
   0x5   :  { %p409_p0 = scmp.ne.s32.totalorder %s25_s25, %s408_s26  ;;  %p414_p2 = scmp.lt.s32.totalorder %s408_s26, %s408_s26 }
   0x7   :  { %p415_p3 = por %p414_p2, %p413_p1 }
   0x9   :  { %p416_p4 = pnand %p415_p3, %p409_p0 }
   0xb   :  { %419 = shalt.err (!%p416_p4)
}
   0xc   :  { %s467_s27 = smov 64   ;;  %s468_s28 = smov 4  }
   0xd   :  { %30 = dma.hbm_to_vmem [thread:$0]  %s557_s2, 128, %s25_s25, [#allocation3], %s467_s27, %s467_s27, %s468_s28  }
   0xe   :  { %s469_s8 = smov [#allocation5]  }
   0xf   :  { %s40_s9 = sshll.u32 %s469_s8, 4  ;;  %s41_s9 = int_to_ptr.vmem [resolvable:$true] %s40_s9 }
  0x10   :  { %s428_s10 = scalar_lea.vmem %s41_s9, 1024  ;;  %p433_p6 = scmp.lt.s32.totalorder %s41_s9, %s41_s9 }
  0x11   :  { %p429_p5 = scmp.ne.s32.totalorder %s41_s9, %s428_s10  ;;  %p434_p7 = scmp.lt.s32.totalorder %s428_s10, %s428_s10 }
  0x13   :  { %p435_p8 = por %p434_p7, %p433_p6 }
  0x15   :  { %p436_p9 = pnand %p435_p8, %p429_p5 }
  0x17   :  { %439 = shalt.err (!%p436_p9)
}
  0x18   :  { %46 = dma.hbm_to_vmem [thread:$0]  %s560_s5, 1024, %s41_s9, [#allocation6], %s467_s27, %s467_s27, %s468_s28  }
  0x19   :  { %460 = dma.done.wait [#allocation3], 128  }
  0x1a   :  { %461 = vsyncadd [#allocation3], 4294967168 }
  0x1b   :  { %462 = dma.done.wait [#allocation6], 1024  }
  0x1c   :  { %463 = vsyncadd [#allocation6], 4294966272  ;;  %v470_v0 = vmov 0.0   ;;  %vm471_vm0 = vmmov 0   ;;  %vm73_vm1 = vcmask 1041408   ;;  %v58_v2 = vld [vmem:[%s556_s1] sm:$0xff] }
  0x1d   :  { %352 = vmatprep.subr.bf16.mxu0 %v470_v0  ;;  %354 = vmatprep.mubr.msk.bf16.mxu0 %vm471_vm0, %v470_v0  ;;  %v61_v1 = vld [vmem:[%s558_s3] sm:$0x3]  ;;  %v59_v3 = vld [vmem:[%s556_s1 + $0x8] sm:$0xff]  ;;  %vm69_vm2 = vcmask 31744   ;;  %v392_v7 = vld [vmem:[#allocation5 + $0x30] sm:$0xff]   ;;  %vm235_vm3 = vcmask 130048  }
  0x1e   :  { %358 = vmatprep.subr.bf16.mxu1 %v470_v0  ;;  %374 = vmatprep.mubr.msk.bf16.mxu1 %vm471_vm0, %v470_v0  ;;  %v75_v4 = vsel %vm73_vm1, %v61_v1, 0  ;;  %v60_v5 = vpack.c.bf16 %v59_v3, %v58_v2  ;;  %v391_v6 = vld [vmem:[#allocation5 + $0x38] sm:$0xff]   ;;  %v393_v8 = vld [vmem:[#allocation5 + $0x28] sm:$0xff]   ;;  %v394_v9 = vld [vmem:[#allocation5 + $0x20] sm:$0xff]  }
  0x1f   :  { %353 = vmatpush3.bf16.msra.mxu0 %v75_v4  ;;  %359 = vmatpush3.bf16.msra.mxu1 %v391_v6  ;;  %v395_v10 = vld [vmem:[#allocation5 + $0x18] sm:$0xff]   ;;  %v396_v11 = vld [vmem:[#allocation5 + $0x10] sm:$0xff]   ;;  %v398_v13 = vld [vmem:[#allocation5 + $0x8] sm:$0xff]  }
  0x20   :  { %378 = vmatprep.subr.bf16.mxu0 %v470_v0  ;;  %360 = vmatprep.subr.bf16.mxu1 %v470_v0  ;;  %v397_v12 = vld [vmem:[#allocation2] sm:$0xff]   ;;  %v57_v15 = vld [vmem:[%s555_s0 + $0x8] sm:$0xff] }
  0x21   :  { %v56_v14 = vld [vmem:[%s555_s0] sm:$0xff]  ;;  %v399_v17 = vld [vmem:[#allocation5] sm:$0xff]  }
  0x22   :  { %355 = vmatmul.mubr.msk.bf16.vlgmr.msra.gmra.mxu0 %vm69_vm2, %v60_v5  ;;  %v120_v16 = vpack.c.bf16 %v57_v15, %v56_v14  ;;  %v317_v18 = vld [vmem:[%s559_s4] ss:$0 sm:$0xff]  ;;  %s472_s4 = smov [#allocation7]  }
  0x23   :  { %380 = vmatprep.mubr.msk.bf16.mxu0 %vm471_vm0, %v470_v0  ;;  %361 = vmatpush3.bf16.msra.mxu1 %v392_v7  ;;  %v329_v35 = vld [vmem:[%s561_s6] ss:$0 sm:$0xff]  ;;  %s304_s22 = sshll.u32 %s472_s4, 4  ;;  %s305_s22 = int_to_ptr.vmem [resolvable:$true] %s304_s22 }
  0x24   :  { %362 = vmatprep.subr.bf16.mxu1 %v470_v0  ;;  %379 = vmatpush3.bf16.msra.mxu0 %v397_v12  ;;  %s440_s23 = scalar_lea.vmem %s305_s22, 128  ;;  %p445_p11 = scmp.lt.s32.totalorder %s305_s22, %s305_s22 }
  0x25   :  { %p441_p10 = scmp.ne.s32.totalorder %s305_s22, %s440_s23  ;;  %p446_p12 = scmp.lt.s32.totalorder %s440_s23, %s440_s23 }
  0x27   :  { %363 = vmatpush3.bf16.msra.mxu1 %v393_v8  ;;  %p447_p13 = por %p446_p12, %p445_p11 }
  0x28   :  { %364 = vmatprep.subr.bf16.mxu1 %v470_v0 }
  0x29   :  { %p448_p0 = pnand %p447_p13, %p441_p10 }
  0x2a   :  { %381 = vmatmul.mubr.msk.bf16.vlgmr.msra.gmra.mxu0 %vm235_vm3, %v120_v16 }
  0x2b   :  { %365 = vmatpush3.bf16.msra.mxu1 %v394_v9 }
  0x2c   :  { %366 = vmatprep.subr.bf16.mxu1 %v470_v0 }
  0x2f   :  { %367 = vmatpush3.bf16.msra.mxu1 %v395_v10 }
  0x30   :  { %368 = vmatprep.subr.bf16.mxu1 %v470_v0 }
  0x33   :  { %369 = vmatpush3.bf16.msra.mxu1 %v396_v11 }
  0x34   :  { %370 = vmatprep.subr.bf16.mxu1 %v470_v0 }
  0x37   :  { %371 = vmatpush3.bf16.msra.mxu1 %v398_v13 }
  0x38   :  { %372 = vmatprep.subr.bf16.mxu1 %v470_v0 }
  0x3b   :  { %373 = vmatpush3.bf16.msra.mxu1 %v399_v17 }
  0xe2   :  { %v111_v19 = vpop.f32.mrf.mxu0 }
  0xe3   :  { %v112_v21 = vadd.f32 %v317_v18, %v111_v19 }
  0xe4   :  { %v356_v20 = vpop.f32.mrf.mxu0 }
  0xe5   :  { %v118_v25 = vmax.f32 %v112_v21, 0.0 }
  0xe6   :  { %v114_v22 = vpop.f32.mrf.mxu0 }
  0xe7   :  { %v115_v23 = vadd.f32 %v317_v18, %v114_v22 }
  0xe8   :  { %v357_v24 = vpop.f32.mrf.mxu0 }
  0xe9   :  { %v119_v26 = vmax.f32 %v115_v23, 0.0 }
  0xea   :  { %v273_v28 = vpop.f32.mrf.mxu0 }
  0xeb   :  { %v123_v27 = vpack.c.bf16 %v119_v26, %v118_v25 }
  0xec   :  { %v382_v29 = vpop.f32.mrf.mxu0 }
  0xed   :  { %375 = vmatmul.mubr.bf16.vlgmr.msra.gmra.mxu1 %v123_v27 }
  0xee   :  { %v276_v30 = vpop.f32.mrf.mxu0 }
  0xf0   :  { %v383_v31 = vpop.f32.mrf.mxu0 }
 0x1ad   :  { %v222_v32 = vpop.f32.mrf.mxu1 }
 0x1ae   :  { %v274_v34 = vadd.f32 %v273_v28, %v222_v32 }
 0x1af   :  { %v376_v33 = vpop.f32.mrf.mxu1 }
 0x1b0   :  { %v287_v39 = vadd.f32 %v329_v35, %v274_v34 }
 0x1b1   :  { %v225_v36 = vpop.f32.mrf.mxu1 }
 0x1b2   :  { %v277_v37 = vadd.f32 %v276_v30, %v225_v36 }
 0x1b3   :  { %v377_v38 = vpop.f32.mrf.mxu1 }
 0x1b4   :  { %v288_v40 = vadd.f32 %v329_v35, %v277_v37 }
 0x1b6   :  { %v337_v41 = vpack.c.bf16 %v288_v40, %v287_v39 }
 0x1b8   :  { %338 = vst [vmem:[#allocation7] sm:$0xff] %v337_v41  }
 0x1b9   :  { %451 = shalt.err (!%p448_p0)
}
 0x1ba   :  { %310 = dma.vmem_to_hbm [thread:$0]  %s305_s22, 128, %s562_s7, [#allocation4], %s467_s27, %s467_s27, %s468_s28  }
 0x1bb   :  { %464 = dma.done.wait [#allocation4], 128  }
 0x1bc   :  { %465 = vsyncadd [#allocation4], 4294967168 }
 0x1bd   :  { %314 = vsyncpa [#allocation3], 1 }
 0x1be   :  { %315 = vsyncpa [#allocation6], 1 }
 0x1bf   :  { %316 = vsyncpa [#allocation4], 1 }

</bundles_post_ra>
